<compile_context>
chip_gen: v5e
topology: v5e:2x2
jax: 0.10.0
libtpu: 0.0.40
codegen_flags: <defaults>
</compile_context>

<pallas_src>
import jax
import jax.numpy as jnp
from jax import lax
from jax.experimental import pallas as pl
from jax.experimental.pallas import tpu as pltpu

BN_EPS = 1e-5
LANES = 128
DEFAULT_TILE_ROWS = 2048          # 2048 x 128 x 4B = 1 MiB f32 per tile


def _round_up(v, m):
    return (v + m - 1) // m * m


def _cdiv(a, b):
    return -(-a // b)


def _vmem_capacity_bytes():
    try:
        info = pltpu.get_tpu_info()
        return int(getattr(info, "vmem_capacity_bytes", 64 << 20))
    except Exception:
        return 64 << 20


def _collapse_scale(ws, gs, var):
    """a_{k+1} = g_k * w_k * a_k * rsqrt(w_k^2 * a_k^2 * var + eps), k=0..2."""
    a = jnp.float32(1.0)
    for w, g in zip(ws, gs):
        a = g * w * a * lax.rsqrt(w * w * a * a * var + jnp.float32(BN_EPS))
    return a


def _choose_view(shape):
    """Copy-less 2D view of the flattened tensor: lane-dense (., 128) when the
    element count divides 128, otherwise (N*H, W)."""
    n, c, h, w = shape
    total = n * c * h * w
    if total % LANES == 0:
        return total // LANES, LANES
    return n * c * h, w


# --------------------------- fast single-call path ---------------------------
def _fused_single_call(x2d, params, total, vmem_cap):
    inv_n = 1.0 / float(total)

    def kernel(p_ref, x_ref, o_ref):
        xf = x_ref[...].astype(jnp.float32)
        mean = jnp.sum(xf) * inv_n
        d = xf - mean
        var = jnp.maximum(jnp.sum(d * d) * inv_n, 0.0)   # centered variance
        ws = [p_ref[0], p_ref[4], p_ref[8]]
        gs = [p_ref[2], p_ref[6], p_ref[10]]
        a = _collapse_scale(ws, gs, var)
        cc = p_ref[11] - a * mean
        o_ref[...] = (a * xf + cc).astype(o_ref.dtype)

    vmem_limit = int(min(vmem_cap * 3 // 4, 48 << 20))
    return pl.pallas_call(
        kernel,
        out_shape=jax.ShapeDtypeStruct(x2d.shape, x2d.dtype),
        in_specs=[
            pl.BlockSpec(memory_space=pltpu.MemorySpace.SMEM),
            pl.BlockSpec(memory_space=pltpu.MemorySpace.VMEM),
        ],
        out_specs=pl.BlockSpec(memory_space=pltpu.MemorySpace.VMEM),
        compiler_params=pltpu.CompilerParams(vmem_limit_bytes=vmem_limit),
    )(params.astype(jnp.float32), x2d)


# ------------------------------- tiled path ----------------------------------
def _fused_tiled(x2d, params, total, tile_rows):
    R, C = x2d.shape
    tile_rows = max(8, _round_up(int(tile_rows), 8))
    if R > 8:
        # >= 2 tiles so both v7x TensorCores get work; cap at tile_rows.
        tr = min(tile_rows, _round_up(_cdiv(R, 2), 8))
    else:
        tr = _round_up(R, 8)
    num_tiles = _cdiv(R, tr)

    # ---- pass 1: per-tile partial statistics (masked ragged last tile) ----
    def stats_kernel(x_ref, part_ref):
        i = pl.program_id(0)
        xf = x_ref[...].astype(jnp.float32)
        row_ids = lax.broadcasted_iota(jnp.int32, (tr, C), 0)
        valid_rows = R - i * tr                   # >= tr except on last tile
        mask = row_ids < valid_rows
        xz = jnp.where(mask, xf, 0.0)
        s_lane = jnp.sum(xz, axis=0, keepdims=True)               # (1, C)
        n_valid = jnp.minimum(valid_rows, tr).astype(jnp.float32) * C
        tile_mean = jnp.sum(s_lane) / n_valid
        dz = jnp.where(mask, xf - tile_mean, 0.0)
        m2_lane = jnp.sum(dz * dz, axis=0, keepdims=True)         # (1, C)
        part_ref[0:1, :] = s_lane
        part_ref[1:2, :] = m2_lane

    partials = pl.pallas_call(
        stats_kernel,
        out_shape=jax.ShapeDtypeStruct((num_tiles, 2, C), jnp.float32),
        grid=(num_tiles,),
        in_specs=[pl.BlockSpec((tr, C), lambda i: (i, 0))],
        out_specs=pl.BlockSpec((None, 2, C), lambda i: (i, 0, 0)),
        compiler_params=pltpu.CompilerParams(
            dimension_semantics=("parallel",)),
    )(x2d)

    # ---- tiny cross-tile combine (Chan's parallel variance) ----
    counts = jnp.asarray(
        [float(min(tr, R - t * tr) * C) for t in range(num_tiles)], jnp.float32)
    count = jnp.float32(total)
    tile_sums = jnp.sum(partials[:, 0, :], axis=-1)               # (num_tiles,)
    tile_m2 = jnp.sum(partials[:, 1, :], axis=-1)                 # (num_tiles,)
    mean = jnp.sum(tile_sums) / count
    tile_means = tile_sums / counts
    var = jnp.maximum(
        (jnp.sum(tile_m2) + jnp.sum(counts * (tile_means - mean) ** 2)) / count,
        0.0)

    p = params.astype(jnp.float32)
    a = _collapse_scale([p[0], p[4], p[8]], [p[2], p[6], p[10]], var)
    cc = p[11] - a * mean
    ac = jnp.stack([a, cc]).astype(jnp.float32)                   # (2,) in SMEM

    # ---- pass 2: streaming FMA out = A*x + C ----
    def apply_kernel(ac_ref, x_ref, o_ref):
        o_ref[...] = (ac_ref[0] * x_ref[...].astype(jnp.float32)
                      + ac_ref[1]).astype(o_ref.dtype)

    out2d = pl.pallas_call(
        apply_kernel,
        out_shape=jax.ShapeDtypeStruct((R, C), x2d.dtype),
        grid=(num_tiles,),
        in_specs=[
            pl.BlockSpec(memory_space=pltpu.MemorySpace.SMEM),
            pl.BlockSpec((tr, C), lambda i: (i, 0)),
        ],
        out_specs=pl.BlockSpec((tr, C), lambda i: (i, 0)),
        compiler_params=pltpu.CompilerParams(
            dimension_semantics=("parallel",)),
    )(ac, x2d)
    return out2d


def fused_conv_bn_forward(x, params, *, tile_rows=DEFAULT_TILE_ROWS,
                          force_tiled=False):
    """x: (N, 1, H, W) float.  params: (12,) f32
    = [w1, b1, g1, be1, w2, b2, g2, be2, w3, b3, g3, be3]."""
    n, c, h, w = x.shape
    assert c == 1, "module M is defined for a single channel"
    total = n * c * h * w

    R, C = _choose_view(x.shape)
    x2d = x.reshape(R, C)                       # free reshape, no copy / pad

    vmem_cap = _vmem_capacity_bytes()
    x_f32_bytes = total * 4
    fast_ok = (not force_tiled) and x_f32_bytes <= min(vmem_cap // 6, 10 << 20)

    if fast_ok:
        out2d = _fused_single_call(x2d, params, total, vmem_cap)
    else:
        out2d = _fused_tiled(x2d, params, total, tile_rows)
    return out2d.reshape(n, c, h, w)            # free reshape back, no slice


def init_params(key):
    """Deterministic init mimicking PyTorch defaults for M().

    Conv2d(1,1,1): weight, bias ~ U(-1, 1) (fan_in = 1 -> bound = 1)
    BatchNorm2d(1): gamma = 1, beta = 0
    """
    ks = jax.random.split(key, 6)
    w1 = jax.random.uniform(ks[0], (), jnp.float32, -1.0, 1.0)
    b1 = jax.random.uniform(ks[1], (), jnp.float32, -1.0, 1.0)
    w2 = jax.random.uniform(ks[2], (), jnp.float32, -1.0, 1.0)
    b2 = jax.random.uniform(ks[3], (), jnp.float32, -1.0, 1.0)
    w3 = jax.random.uniform(ks[4], (), jnp.float32, -1.0, 1.0)
    b3 = jax.random.uniform(ks[5], (), jnp.float32, -1.0, 1.0)
    one = jnp.float32(1.0)
    zero = jnp.float32(0.0)
    # [w1, b1, g1, be1, w2, b2, g2, be2, w3, b3, g3, be3]
    return jnp.stack(
        [w1, b1, one, zero, w2, b2, one, zero, w3, b3, one, zero]
    ).astype(jnp.float32)


def _reference(x, p):
    """Pure-JAX reference of M.forward (per-stage, training-mode batchnorm)."""
    def bn(y, g, b):
        m = jnp.mean(y)
        v = jnp.mean((y - m) ** 2)
        return g * (y - m) / jnp.sqrt(v + BN_EPS) + b

    y = p[0] * x + p[1]
    y = bn(y, p[2], p[3])
    y = p[4] * y + p[5]
    y = bn(y, p[6], p[7])
    y = p[8] * y + p[9]
    y = bn(y, p[10], p[11])
    return y


if __name__ == "__main__":
    key = jax.random.PRNGKey(0)
    k_x1, k_p, k_x2, k_x3 = jax.random.split(key, 4)
    params = init_params(k_p)

    # 1) Fast single-pass VMEM-resident path, lane-dense view (total % 128 == 0).
    x1 = jax.random.normal(k_x1, (2, 1, 16, 16), dtype=jnp.float32)
    o1 = jax.block_until_ready(fused_conv_bn_forward(x1, params))
    r1 = _reference(x1, params)
    assert o1.shape == x1.shape
    assert jnp.allclose(o1, r1, atol=1e-5, rtol=1e-5), float(
        jnp.max(jnp.abs(o1 - r1)))

    # 2) Tiled two-pass path, total not divisible by 128 (lane width = W),
    #    multi-tile grid with a ragged, masked last tile, no pad/slice copies.
    x2 = jax.random.normal(k_x2, (2, 1, 30, 48), dtype=jnp.float32)
    o2 = jax.block_until_ready(
        fused_conv_bn_forward(x2, params, tile_rows=8, force_tiled=True))
    r2 = _reference(x2, params)
    assert o2.shape == x2.shape
    assert jnp.allclose(o2, r2, atol=1e-5, rtol=1e-5), float(
        jnp.max(jnp.abs(o2 - r2)))

    # 3) Tiled path, lane-dense (., 128) view with ragged last tile + Chan combine.
    x3 = jax.random.normal(k_x3, (2, 1, 20, 64), dtype=jnp.float32)
    o3 = jax.block_until_ready(
        fused_conv_bn_forward(x3, params, tile_rows=8, force_tiled=True))
    r3 = _reference(x3, params)
    assert o3.shape == x3.shape
    assert jnp.allclose(o3, r3, atol=1e-5, rtol=1e-5), float(
        jnp.max(jnp.abs(o3 - r3)))

    print("KERNEL_OK")
</pallas_src>

<mosaic_0001>
module attributes {stable_mosaic.version = 11 : i64} {
  func.func @kernel(%arg0: memref<12xf32, #tpu.memory_space<smem>>, %arg1: memref<4x128xf32, #tpu.memory_space<vmem>>, %arg2: memref<4x128xf32, #tpu.memory_space<vmem>>) attributes {dimension_semantics = [], scalar_prefetch = 0 : i64, scratch_operands = 0 : i64, tpu.core_type = #tpu.core_type<tc>} {
    %c0 = arith.constant 0 : index
    %c0_0 = arith.constant 0 : index
    %0 = vector.load %arg1[%c0, %c0_0] : memref<4x128xf32, #tpu.memory_space<vmem>>, vector<4x128xf32>
    %1 = vector.shape_cast %0 : vector<4x128xf32> to vector<1x4x128xf32>
    %cst = arith.constant dense<0.000000e+00> : vector<1xf32>
    %2 = vector.multi_reduction <add>, %1, %cst [1, 2] : vector<1x4x128xf32> to vector<1xf32>
    %3 = vector.shape_cast %2 : vector<1xf32> to vector<1x1x1xf32>
    %4 = vector.extract %3[0, 0, 0] : f32 from vector<1x1x1xf32>
    %cst_1 = arith.constant 0.001953125 : f32
    %5 = arith.mulf %4, %cst_1 : f32
    %6 = vector.broadcast %5 : f32 to vector<4x128xf32>
    %7 = arith.subf %0, %6 : vector<4x128xf32>
    %8 = arith.mulf %7, %7 : vector<4x128xf32>
    %9 = vector.shape_cast %8 : vector<4x128xf32> to vector<1x4x128xf32>
    %cst_2 = arith.constant dense<0.000000e+00> : vector<1xf32>
    %10 = vector.multi_reduction <add>, %9, %cst_2 [1, 2] : vector<1x4x128xf32> to vector<1xf32>
    %11 = vector.shape_cast %10 : vector<1xf32> to vector<1x1x1xf32>
    %12 = vector.extract %11[0, 0, 0] : f32 from vector<1x1x1xf32>
    %cst_3 = arith.constant 0.001953125 : f32
    %13 = arith.mulf %12, %cst_3 : f32
    %cst_4 = arith.constant 0.000000e+00 : f32
    %14 = arith.maximumf %13, %cst_4 : f32
    %c0_5 = arith.constant 0 : index
    %15 = memref.load %arg0[%c0_5] : memref<12xf32, #tpu.memory_space<smem>>
    %c4 = arith.constant 4 : index
    %16 = memref.load %arg0[%c4] : memref<12xf32, #tpu.memory_space<smem>>
    %c8 = arith.constant 8 : index
    %17 = memref.load %arg0[%c8] : memref<12xf32, #tpu.memory_space<smem>>
    %c2 = arith.constant 2 : index
    %18 = memref.load %arg0[%c2] : memref<12xf32, #tpu.memory_space<smem>>
    %c6 = arith.constant 6 : index
    %19 = memref.load %arg0[%c6] : memref<12xf32, #tpu.memory_space<smem>>
    %c10 = arith.constant 10 : index
    %20 = memref.load %arg0[%c10] : memref<12xf32, #tpu.memory_space<smem>>
    %21 = arith.mulf %18, %15 : f32
    %cst_6 = arith.constant 1.000000e+00 : f32
    %22 = arith.mulf %21, %cst_6 : f32
    %23 = arith.mulf %15, %15 : f32
    %cst_7 = arith.constant 1.000000e+00 : f32
    %24 = arith.mulf %23, %cst_7 : f32
    %cst_8 = arith.constant 1.000000e+00 : f32
    %25 = arith.mulf %24, %cst_8 : f32
    %26 = arith.mulf %25, %14 : f32
    %cst_9 = arith.constant 9.99999974E-6 : f32
    %27 = arith.addf %26, %cst_9 : f32
    %28 = math.rsqrt %27 : f32
    %29 = arith.mulf %22, %28 : f32
    %30 = arith.mulf %19, %16 : f32
    %31 = arith.mulf %30, %29 : f32
    %32 = arith.mulf %16, %16 : f32
    %33 = arith.mulf %32, %29 : f32
    %34 = arith.mulf %33, %29 : f32
    %35 = arith.mulf %34, %14 : f32
    %cst_10 = arith.constant 9.99999974E-6 : f32
    %36 = arith.addf %35, %cst_10 : f32
    %37 = math.rsqrt %36 : f32
    %38 = arith.mulf %31, %37 : f32
    %39 = arith.mulf %20, %17 : f32
    %40 = arith.mulf %39, %38 : f32
    %41 = arith.mulf %17, %17 : f32
    %42 = arith.mulf %41, %38 : f32
    %43 = arith.mulf %42, %38 : f32
    %44 = arith.mulf %43, %14 : f32
    %cst_11 = arith.constant 9.99999974E-6 : f32
    %45 = arith.addf %44, %cst_11 : f32
    %46 = math.rsqrt %45 : f32
    %47 = arith.mulf %40, %46 : f32
    %c11 = arith.constant 11 : index
    %48 = memref.load %arg0[%c11] : memref<12xf32, #tpu.memory_space<smem>>
    %49 = arith.mulf %47, %5 : f32
    %50 = arith.subf %48, %49 : f32
    %51 = vector.broadcast %47 : f32 to vector<4x128xf32>
    %52 = arith.mulf %51, %0 : vector<4x128xf32>
    %53 = vector.broadcast %50 : f32 to vector<4x128xf32>
    %54 = arith.addf %52, %53 : vector<4x128xf32>
    %c0_12 = arith.constant 0 : index
    %c0_13 = arith.constant 0 : index
    %55 = vector.load %arg2[%c0_12, %c0_13] : memref<4x128xf32, #tpu.memory_space<vmem>>, vector<4x128xf32>
    tpu.vector_store %arg2[%c0_12, %c0_13], %54 {strides = array<i32>} : memref<4x128xf32, #tpu.memory_space<vmem>>, vector<4x128xf32>,
    return
  }
}

</mosaic_0001>

<bundles_post_ra>
// kernel: tpu_custom_call.1
= control target key start
LH: loop header
LB: loop body
LE: loop exit
PB: predicated region body
PF: predicated region fallthrough
CT: control target
= control target key end

     0   :  { %7 = vsyncpa [#allocation5], 0  ;;  %s300_s0 = inlined_call_operand.hbm [shape: f32[12], index: 0, kind: input, shape index: {}]   ;;  %s301_s1 = inlined_call_operand.hbm [shape: f32[4,128], index: 1, kind: input, shape index: {}]   ;;  %s302_s2 = inlined_call_operand.hbm [shape: f32[4,128], index: 2, kind: output, shape index: {}]  }
   0x1   :  { %8 = vsyncpa [#allocation3], 0 }
   0x2   :  { %9 = vsyncpa [#allocation4], 0  ;;  %s15_s11 = sshll.u32 %s300_s0, 4  ;;  %s24_s14 = sshll.u32 %s301_s1, 4  ;;  %s16_s11 = int_to_ptr.hbm [resolvable:$true] %s15_s11  ;;  %s25_s14 = int_to_ptr.hbm [resolvable:$true] %s24_s14 }
   0x3   :  { %s248_s15 = smov [#allocation2]   ;;  %s249_s16 = smov [#allocation6]  }
   0x4   :  { %18 = dma.hbm_to_smem %s16_s11, 16, %s248_s15, [#allocation5]  }
   0x5   :  { %s26_s17 = sshll.u32 %s249_s16, 4  ;;  %s27_s17 = int_to_ptr.vmem [resolvable:$true] %s26_s17 }
   0x6   :  { %29 = dma.hbm_to_vmem [thread:$0]  %s25_s14, 64, %s27_s17, [#allocation3]  }
   0x7   :  { %242 = dma.done.wait [#allocation5], 16  }
   0x8   :  { %243 = vsyncadd [#allocation5], 4294967280 }
   0x9   :  { %244 = dma.done.wait [#allocation3], 64  }
   0xa   :  { %245 = vsyncadd [#allocation3], 4294967232 }
   0xb   :  { %38 = sfence }
   0xc   :  { %v273_v0 = vld [vmem:[#allocation6] sm:$0xf]  ;;  %vm40_vm0 = vcmask 1043456   ;;  %s284_s18 = sld [smem:[#allocation2]]  ;;  %s250_s22 = smov 0.0  }
   0xd   :  { %v41_v1 = vsel %vm40_vm0, %v273_v0, 0.0  ;;  %s158_s26 = sld [smem:[#allocation2 + $0x2]] }
   0xe   :  { %42 = vadd.xlane.f32.xlu0 %v41_v1  ;;  %s156_s27 = sld [smem:[#allocation2 + $0x4]] }
   0xf   :  { %s159_s28 = sld [smem:[#allocation2 + $0x6]] }
  0x10   :  { %s157_s11 = sld [smem:[#allocation2 + $0x8]] }
  0x11   :  { %s160_s12 = sld [smem:[#allocation2 + $0xa]] }
  0x12   :  { %s74_s20 = smul.f32 %s284_s18, %s284_s18 }
  0x13   :  { %s73_s29 = smul.f32 %s158_s26, %s284_s18  ;;  %s251_s26 = smov [#allocation7]  }
  0x14   :  { %s92_s30 = smul.f32 %s156_s27, %s156_s27 }
  0x15   :  { %s90_s4 = smul.f32 %s159_s28, %s156_s27  ;;  %s143_s27 = sshll.u32 %s251_s26, 4  ;;  %s144_s27 = int_to_ptr.vmem [resolvable:$true] %s143_s27 }
  0x16   :  { %s112_s13 = smul.f32 %s157_s11, %s157_s11 }
  0x17   :  { %s110_s15 = smul.f32 %s160_s12, %s157_s11 }
  0x81   :  { %v43_v2 = vpop.xlane.xlu0 %42 }
  0x82   :  { %v44_v3 = vrot.slane %v43_v2, 4 }
  0x84   :  { %v45_v4 = vadd.f32 %v44_v3, %v43_v2 }
  0x86   :  { %v46_v5 = vrot.slane %v45_v4, 2 }
  0x88   :  { %v47_v6 = vadd.f32 %v46_v5, %v45_v4 }
  0x8a   :  { %v48_v7 = vrot.slane %v47_v6, 1 }
  0x8c   :  { %v49_v8 = vadd.f32 %v48_v7, %v47_v6 }
  0x8e   :  { %162 = vpush %v49_v8 }
  0xbf   :  { %s277_s0 = spop %162 }
  0xc0   :  { %s51_s1 = smul.f32 0.001953125, %s277_s0 }
  0xc2   :  { %v52_v9 = vstv %s51_s1 }
  0xc3   :  { %v53_v10 = vsub.f32 %v273_v0, %v52_v9 }
  0xc5   :  { %v54_v11 = vmul.f32 %v53_v10, %v53_v10 }
  0xc7   :  { %v55_v12 = vsel %vm40_vm0, %v54_v11, 0.0 }
  0xc8   :  { %56 = vadd.xlane.f32.xlu0 %v55_v12 }
 0x13b   :  { %v57_v13 = vpop.xlane.xlu0 %56 }
 0x13c   :  { %v58_v14 = vrot.slane %v57_v13, 4 }
 0x13e   :  { %v59_v15 = vadd.f32 %v58_v14, %v57_v13 }
 0x140   :  { %v60_v16 = vrot.slane %v59_v15, 2 }
 0x142   :  { %v61_v17 = vadd.f32 %v60_v16, %v59_v15 }
 0x144   :  { %v62_v18 = vrot.slane %v61_v17, 1 }
 0x146   :  { %v63_v19 = vadd.f32 %v62_v18, %v61_v17 }
 0x148   :  { %164 = vpush %v63_v19 }
 0x179   :  { %s165_s19 = spop %164 }
 0x17a   :  { %s65_s21 = smul.f32 0.001953125, %s165_s19 }
 0x17c   :  { %s288_s23 = smax.f32 %s250_s22, %s65_s21  ;;  %s161_s22 = sld [smem:[#allocation2 + $0xb]] }
 0x17d   :  { %s75_s24 = smul.f32 %s74_s20, %s288_s23 }
 0x17f   :  { %s76_s25 = sadd.f32 1e-05, %s75_s24 }
 0x181   :  { %v77_v20 = vstv %s76_s25 }
 0x182   :  { %176 = vrsqrt.f32 %v77_v20  ;;  %vm84_vm2 = vweird.f32 %v77_v20 }
 0x188   :  { %v177_v21 = vpop.eup %176 }
 0x189   :  { %v79_v22 = vmul.f32 %v177_v21, %v77_v20  ;;  %vm85_vm1 = vweird.f32 %v177_v21 }
 0x18a   :  { %vm86_vm3 = vmor %vm84_vm2, %vm85_vm1 }
 0x18b   :  { %v80_v23 = vmul.f32 %v177_v21, %v79_v22 }
 0x18d   :  { %v81_v24 = vmul.f32 0.5, %v80_v23 }
 0x18f   :  { %v82_v25 = vsub.f32 1.5, %v81_v24 }
 0x191   :  { %v83_v26 = vmul.f32 %v177_v21, %v82_v25 }
 0x193   :  { %v87_v27 = vsel %vm86_vm3, %v177_v21, %v83_v26 }
 0x194   :  { %166 = vpush %v87_v27 }
 0x1c5   :  { %s167_s3 = spop %166 }
 0x1c6   :  { %s89_s5 = smul.f32 %s167_s3, %s73_s29  ;;  %s145_s3 = sshll.u32 %s302_s2, 4  ;;  %s146_s3 = int_to_ptr.hbm [resolvable:$true] %s145_s3 }
 0x1c8   :  { %s93_s6 = smul.f32 %s92_s30, %s89_s5 }
 0x1c9   :  { %s91_s7 = smul.f32 %s90_s4, %s89_s5 }
 0x1ca   :  { %s94_s8 = smul.f32 %s93_s6, %s89_s5 }
 0x1cc   :  { %s95_s9 = smul.f32 %s94_s8, %s288_s23 }
 0x1ce   :  { %s96_s10 = sadd.f32 1e-05, %s95_s9 }
 0x1d0   :  { %v97_v28 = vstv %s96_s10 }
 0x1d1   :  { %178 = vrsqrt.f32 %v97_v28  ;;  %vm104_vm5 = vweird.f32 %v97_v28 }
 0x1d7   :  { %v179_v29 = vpop.eup %178 }
 0x1d8   :  { %v99_v30 = vmul.f32 %v179_v29, %v97_v28  ;;  %vm105_vm4 = vweird.f32 %v179_v29 }
 0x1d9   :  { %vm106_vm6 = vmor %vm104_vm5, %vm105_vm4 }
 0x1da   :  { %v100_v31 = vmul.f32 %v179_v29, %v99_v30 }
 0x1dc   :  { %v101_v32 = vmul.f32 0.5, %v100_v31 }
 0x1de   :  { %v102_v33 = vsub.f32 1.5, %v101_v32 }
 0x1e0   :  { %v103_v34 = vmul.f32 %v179_v29, %v102_v33 }
 0x1e2   :  { %v107_v35 = vsel %vm106_vm6, %v179_v29, %v103_v34 }
 0x1e3   :  { %168 = vpush %v107_v35 }
 0x214   :  { %s169_s14 = spop %168 }
 0x215   :  { %s109_s16 = smul.f32 %s169_s14, %s91_s7 }
 0x217   :  { %s113_s17 = smul.f32 %s112_s13, %s109_s16 }
 0x218   :  { %s111_s18 = smul.f32 %s110_s15, %s109_s16 }
 0x219   :  { %s114_s19 = smul.f32 %s113_s17, %s109_s16 }
 0x21b   :  { %s115_s20 = smul.f32 %s114_s19, %s288_s23 }
 0x21d   :  { %s116_s21 = sadd.f32 1e-05, %s115_s20 }
 0x21f   :  { %v117_v36 = vstv %s116_s21 }
 0x220   :  { %180 = vrsqrt.f32 %v117_v36  ;;  %vm124_vm8 = vweird.f32 %v117_v36 }
 0x226   :  { %v181_v37 = vpop.eup %180 }
 0x227   :  { %v119_v38 = vmul.f32 %v181_v37, %v117_v36  ;;  %vm125_vm7 = vweird.f32 %v181_v37 }
 0x228   :  { %vm126_vm9 = vmor %vm124_vm8, %vm125_vm7 }
 0x229   :  { %v120_v39 = vmul.f32 %v181_v37, %v119_v38 }
 0x22b   :  { %v121_v40 = vmul.f32 0.5, %v120_v39 }
 0x22d   :  { %v122_v41 = vsub.f32 1.5, %v121_v40 }
 0x22f   :  { %v123_v42 = vmul.f32 %v181_v37, %v122_v41 }
 0x231   :  { %v127_v43 = vsel %vm126_vm9, %v181_v37, %v123_v42 }
 0x232   :  { %170 = vpush %v127_v43 }
 0x263   :  { %s171_s24 = spop %170 }
 0x264   :  { %s129_s25 = smul.f32 %s171_s24, %s111_s18 }
 0x266   :  { %s131_s23 = smul.f32 %s129_s25, %s51_s1  ;;  %v133_v44 = vstv %s129_s25 }
 0x267   :  { %v134_v45 = vmul.f32 %v133_v44, %v273_v0 }
 0x268   :  { %s132_s28 = ssub.f32 %s161_s22, %s131_s23 }
 0x26a   :  { %v135_v46 = vstv %s132_s28 }
 0x26b   :  { %v136_v47 = vadd.f32 %v135_v46, %v134_v45 }
 0x26d   :  { %137 = vst [vmem:[#allocation7] sm:$0xf] %v136_v47 }
 0x26e   :  { %148 = dma.vmem_to_hbm [thread:$0]  %s144_s27, 64, %s146_s3, [#allocation4]  }
 0x26f   :  { %246 = dma.done.wait [#allocation4], 64  }
 0x270   :  { %247 = vsyncadd [#allocation4], 4294967232 }
 0x271   :  { %153 = vsyncpa [#allocation3], 1 }
 0x272   :  { %154 = vsyncpa [#allocation4], 1 }
 0x273   :  { %155 = vsyncpa [#allocation5], 1 }

</bundles_post_ra>
